<compile_context>
chip_gen: v5e
topology: v5e:2x2
jax: 0.10.0
libtpu: 0.0.40
codegen_flags: <defaults>
</compile_context>

<pallas_src>
import functools

import jax
import jax.numpy as jnp
from jax.experimental import pallas as pl
from jax.experimental.pallas import tpu as pltpu


def _mha_map_kernel(q_ref, k_ref, wq_ref, bq_ref, wk_ref, bk_ref,
                    out_ref, scores_ref,
                    *, num_heads, head_dim, normalize_fact):
    # q_ref  : [1, Qb, Cin]  bf16     k_ref : [1, Cin, HW] bf16 (flattened NCHW)
    # wq_ref : [Cin, hidden] bf16     wk_ref: [hidden, Cin] bf16 (native layout)
    # bq_ref : [1, hidden]   f32      bk_ref: [hidden, 1]   f32
    # out_ref: [1, Qb, num_heads*HW] f32
    # scores_ref: VMEM scratch [Qb, num_heads*HW] f32
    qv = q_ref[0]                        # [Qb, Cin]
    kv = k_ref[0]                        # [Cin, HW]
    hw = kv.shape[1]

    # q projection (+bias); hoist the per-head scale to a single multiply.
    qp = jnp.dot(qv, wq_ref[...], preferred_element_type=jnp.float32) + bq_ref[...]
    qp = (qp * normalize_fact).astype(jnp.bfloat16)            # [Qb, hidden]

    # 1x1 conv == channel matmul, produced directly as [hidden, HW]
    # (no NHWC transpose in the wrapper, no kh.T in the kernel).
    kp = jnp.dot(wk_ref[...], kv, preferred_element_type=jnp.float32) + bk_ref[...]
    kp = kp.astype(jnp.bfloat16)                               # [hidden, HW]

    # Per-head scaled QK^T written head-major straight into one scratch
    # (matches torch `weights.flatten(2)`); no concat, no extra copies.
    for n in range(num_heads):
        lo = n * head_dim
        s = jnp.dot(qp[:, lo:lo + head_dim], kp[lo:lo + head_dim, :],
                    preferred_element_type=jnp.float32)        # [Qb, HW]
        scores_ref[:, n * hw:(n + 1) * hw] = s

    # TODO(synk): optional `mask` (masked_fill with -inf before softmax) not
    # plumbed through; the reference call path here uses mask=None.
    # TODO(synk): for non-128-multiple HW (real DETR feature maps) pad HW and
    # mask padded columns to -inf so output stores stay lane-dense.

    # softmax jointly over heads AND spatial positions (torch flatten(2)),
    # in f32; dropout(p=0.0)/eval -> identity.
    scores = scores_ref[...]
    m = jnp.max(scores, axis=-1, keepdims=True)
    e = jnp.exp(scores - m)
    inv = pl.reciprocal(jnp.sum(e, axis=-1, keepdims=True), approx=True)
    out_ref[0] = (e * inv).astype(out_ref.dtype)


def mh_attention_map(q, k_nchw, wq, bq, wk, bk, num_heads, q_block=None):
    """q: [B, Q, Cin] f32, k_nchw: [B, Cin, H, W] f32.

    wq/wk: [hidden, Cin] (PyTorch Linear layout), bq/bk: [hidden].
    Returns attention weights [B, Q, num_heads, H, W] f32.
    """
    B, Q, Cin = q.shape
    _, Ck, H, W = k_nchw.shape
    assert Ck == Cin
    hidden = wq.shape[0]
    head_dim = hidden // num_heads
    HW = H * W
    NHW = num_heads * HW
    normalize_fact = float(hidden / num_heads) ** (-0.5)

    # Default: full Q per grid step (biggest tile wins on v5e/v6e). On v7x
    # (2 TCs, 64 MiB VMEM) pass a smaller q_block (multiple of 8) to shrink
    # the resident scores/out tile and let both cores work.
    if q_block is None:
        q_block = Q
    assert Q % q_block == 0 and (q_block == Q or q_block % 8 == 0)
    n_q_tiles = Q // q_block

    # Free reshape of NCHW (no transpose); bf16 operands for the MXU matmuls.
    k_flat = k_nchw.reshape(B, Cin, HW).astype(jnp.bfloat16)
    q_b = q.astype(jnp.bfloat16)
    wq_t = jnp.transpose(wq).astype(jnp.bfloat16)   # [Cin, hidden] (tiny weight)
    wk_b = wk.astype(jnp.bfloat16)                  # [hidden, Cin] native layout
    bq2 = bq.reshape(1, hidden).astype(jnp.float32)
    bk2 = bk.reshape(hidden, 1).astype(jnp.float32)

    # Explicit VMEM budget: double-buffered pipeline tiles + scores scratch.
    est = (2 * q_block * Cin * 2          # q block
           + 2 * Cin * HW * 2             # k block
           + 4 * Cin * hidden * 2         # wq, wk
           + 4 * hidden * 4               # biases
           + 2 * q_block * NHW * 4        # out block (double buffered)
           + q_block * NHW * 4)           # scores scratch
    vmem_limit = max(32 * 1024 * 1024, min(2 * est, 96 * 1024 * 1024))

    kernel = functools.partial(
        _mha_map_kernel,
        num_heads=num_heads,
        head_dim=head_dim,
        normalize_fact=normalize_fact,
    )

    out = pl.pallas_call(
        kernel,
        out_shape=jax.ShapeDtypeStruct((B, Q, NHW), jnp.float32),
        grid_spec=pltpu.PrefetchScalarGridSpec(
            num_scalar_prefetch=0,
            grid=(B, n_q_tiles),
            in_specs=[
                pl.BlockSpec((1, q_block, Cin), lambda b, qi: (b, qi, 0)),
                pl.BlockSpec((1, Cin, HW), lambda b, qi: (b, 0, 0)),
                pl.BlockSpec((Cin, hidden), lambda b, qi: (0, 0)),
                pl.BlockSpec((1, hidden), lambda b, qi: (0, 0)),
                pl.BlockSpec((hidden, Cin), lambda b, qi: (0, 0)),
                pl.BlockSpec((hidden, 1), lambda b, qi: (0, 0)),
            ],
            out_specs=pl.BlockSpec((1, q_block, NHW), lambda b, qi: (b, qi, 0)),
            scratch_shapes=[pltpu.VMEM((q_block, NHW), jnp.float32)],
        ),
        compiler_params=pltpu.CompilerParams(
            dimension_semantics=("parallel", "parallel"),
            vmem_limit_bytes=vmem_limit),
    )(q_b, k_flat, wq_t, bq2, wk_b, bk2)

    return out.reshape(B, Q, num_heads, H, W)


def _reference(q, k_nchw, wq, bq, wk, bk, num_heads):
    """Pure-JAX f32 reference mirroring the PyTorch forward."""
    B, Q, Cin = q.shape
    hidden = wq.shape[0]
    c = hidden // num_heads
    H, W = k_nchw.shape[2], k_nchw.shape[3]
    norm = float(hidden / num_heads) ** (-0.5)
    qp = q @ wq.T + bq                                        # [B, Q, hidden]
    kp = jnp.einsum('bchw,oc->bohw', k_nchw, wk) + bk[None, :, None, None]
    qh = qp.reshape(B, Q, num_heads, c)
    kh = kp.reshape(B, num_heads, c, H, W)
    wts = jnp.einsum('bqnc,bnchw->bqnhw', qh * norm, kh)
    flat = wts.reshape(B, Q, -1)
    sm = jax.nn.softmax(flat, axis=-1)
    return sm.reshape(B, Q, num_heads, H, W)


if __name__ == "__main__":
    # small shapes: batch=2, query_dim=4, H=W=16, seq(Q)=8, hidden=32, heads=8
    B, Q, Cin, H, W = 2, 8, 4, 16, 16
    hidden, num_heads = 32, 8

    key = jax.random.PRNGKey(0)
    kq, kk, kwq, kwk = jax.random.split(key, 4)

    q = jax.random.normal(kq, (B, Q, Cin), dtype=jnp.float32)
    k = jax.random.normal(kk, (B, Cin, H, W), dtype=jnp.float32)

    # xavier_uniform_ for Linear(query_dim -> hidden): bound = sqrt(6/(fan_in+fan_out))
    bound = (6.0 / (Cin + hidden)) ** 0.5
    wq = jax.random.uniform(kwq, (hidden, Cin), jnp.float32, -bound, bound)
    wk = jax.random.uniform(kwk, (hidden, Cin), jnp.float32, -bound, bound)
    bq = jnp.zeros((hidden,), jnp.float32)   # nn.init.zeros_
    bk = jnp.zeros((hidden,), jnp.float32)

    out = mh_attention_map(q, k, wq, bq, wk, bk, num_heads)
    out = jax.block_until_ready(out)

    ref = _reference(q, k, wq, bq, wk, bk, num_heads)
    assert out.shape == (B, Q, num_heads, H, W)
    # bf16 matmuls + approx reciprocal -> relaxed tolerance vs the f32 reference
    assert jnp.allclose(out, ref, atol=1e-5, rtol=5e-2), "mismatch vs reference"

    print("KERNEL_OK")
</pallas_src>

<mosaic_0001>
module attributes {stable_mosaic.version = 11 : i64} {
  func.func @_mha_map_kernel(%arg0: i32, %arg1: i32, %arg2: memref<1x8x4xbf16, #tpu.memory_space<vmem>>, %arg3: memref<1x4x256xbf16, #tpu.memory_space<vmem>>, %arg4: memref<4x32xbf16, #tpu.memory_space<vmem>>, %arg5: memref<1x32xf32, #tpu.memory_space<vmem>>, %arg6: memref<32x4xbf16, #tpu.memory_space<vmem>>, %arg7: memref<32x1xf32, #tpu.memory_space<vmem>>, %arg8: memref<1x8x2048xf32, #tpu.memory_space<vmem>>, %arg9: memref<8x2048xf32, #tpu.memory_space<vmem>>) attributes {dimension_semantics = [#tpu.dimension_semantics<parallel>, #tpu.dimension_semantics<parallel>], iteration_bounds = array<i64: 2, 1>, scalar_prefetch = 0 : i64, scratch_operands = 1 : i64, tpu.core_type = #tpu.core_type<tc>, window_params = [{transform_indices = @transform_0, window_bounds = array<i64: 1, 8, 4>}, {transform_indices = @transform_1, window_bounds = array<i64: 1, 4, 256>}, {pipeline_mode = #tpu.pipeline_mode<synchronous>, transform_indices = @transform_2, window_bounds = array<i64: 4, 32>}, {pipeline_mode = #tpu.pipeline_mode<synchronous>, transform_indices = @transform_3, window_bounds = array<i64: 1, 32>}, {pipeline_mode = #tpu.pipeline_mode<synchronous>, transform_indices = @transform_4, window_bounds = array<i64: 32, 4>}, {pipeline_mode = #tpu.pipeline_mode<synchronous>, transform_indices = @transform_5, window_bounds = array<i64: 32, 1>}, {transform_indices = @transform_6, window_bounds = array<i64: 1, 8, 2048>}]} {
    %c0 = arith.constant 0 : index
    %c0_0 = arith.constant 0 : index
    %c0_1 = arith.constant 0 : index
    %0 = vector.load %arg2[%c0, %c0_0, %c0_1] : memref<1x8x4xbf16, #tpu.memory_space<vmem>>, vector<1x8x4xbf16>
    %1 = vector.shape_cast %0 : vector<1x8x4xbf16> to vector<8x4xbf16>
    %c0_2 = arith.constant 0 : index
    %c0_3 = arith.constant 0 : index
    %c0_4 = arith.constant 0 : index
    %2 = vector.load %arg3[%c0_2, %c0_3, %c0_4] : memref<1x4x256xbf16, #tpu.memory_space<vmem>>, vector<1x4x256xbf16>
    %3 = vector.shape_cast %2 : vector<1x4x256xbf16> to vector<4x256xbf16>
    %c0_5 = arith.constant 0 : index
    %c0_6 = arith.constant 0 : index
    %4 = vector.load %arg4[%c0_5, %c0_6] : memref<4x32xbf16, #tpu.memory_space<vmem>>, vector<4x32xbf16>
    %cst = arith.constant dense<0.000000e+00> : vector<8x32xf32>
    %5 = tpu.matmul %1, %4, %cst {dimension_numbers = #tpu.dot_dimension_numbers<[1], [0], [0], [1], [0, 0, 1, 1], [], []>} : vector<8x4xbf16>, vector<4x32xbf16>, vector<8x32xf32> -> vector<8x32xf32>
    %c0_7 = arith.constant 0 : index
    %c0_8 = arith.constant 0 : index
    %6 = vector.load %arg5[%c0_7, %c0_8] : memref<1x32xf32, #tpu.memory_space<vmem>>, vector<1x32xf32>
    %7 = vector.broadcast %6 : vector<1x32xf32> to vector<8x32xf32>
    %8 = arith.addf %5, %7 : vector<8x32xf32>
    %cst_9 = arith.constant 5.000000e-01 : f32
    %9 = vector.broadcast %cst_9 : f32 to vector<8x32xf32>
    %10 = arith.mulf %8, %9 : vector<8x32xf32>
    %11 = arith.truncf %10 : vector<8x32xf32> to vector<8x32xbf16>
    %c0_10 = arith.constant 0 : index
    %c0_11 = arith.constant 0 : index
    %12 = vector.load %arg6[%c0_10, %c0_11] : memref<32x4xbf16, #tpu.memory_space<vmem>>, vector<32x4xbf16>
    %cst_12 = arith.constant dense<0.000000e+00> : vector<32x256xf32>
    %13 = tpu.matmul %12, %3, %cst_12 {dimension_numbers = #tpu.dot_dimension_numbers<[1], [0], [0], [1], [0, 0, 1, 1], [], []>} : vector<32x4xbf16>, vector<4x256xbf16>, vector<32x256xf32> -> vector<32x256xf32>
    %c0_13 = arith.constant 0 : index
    %c0_14 = arith.constant 0 : index
    %14 = vector.load %arg7[%c0_13, %c0_14] : memref<32x1xf32, #tpu.memory_space<vmem>>, vector<32x1xf32>
    %15 = vector.broadcast %14 : vector<32x1xf32> to vector<32x256xf32>
    %16 = arith.addf %13, %15 : vector<32x256xf32>
    %17 = arith.truncf %16 : vector<32x256xf32> to vector<32x256xbf16>
    %18 = vector.extract_strided_slice %11 {offsets = [0, 0], sizes = [8, 4], strides = [1, 1]} : vector<8x32xbf16> to vector<8x4xbf16>
    %19 = vector.extract_strided_slice %17 {offsets = [0, 0], sizes = [4, 256], strides = [1, 1]} : vector<32x256xbf16> to vector<4x256xbf16>
    %cst_15 = arith.constant dense<0.000000e+00> : vector<8x256xf32>
    %20 = tpu.matmul %18, %19, %cst_15 {dimension_numbers = #tpu.dot_dimension_numbers<[1], [0], [0], [1], [0, 0, 1, 1], [], []>} : vector<8x4xbf16>, vector<4x256xbf16>, vector<8x256xf32> -> vector<8x256xf32>
    %c0_16 = arith.constant 0 : index
    %c0_17 = arith.constant 0 : index
    %21 = vector.load %arg9[%c0_16, %c0_17] : memref<8x2048xf32, #tpu.memory_space<vmem>>, vector<8x256xf32>
    tpu.vector_store %arg9[%c0_16, %c0_17], %20 {strides = array<i32>} : memref<8x2048xf32, #tpu.memory_space<vmem>>, vector<8x256xf32>,
    %22 = vector.extract_strided_slice %11 {offsets = [0, 4], sizes = [8, 4], strides = [1, 1]} : vector<8x32xbf16> to vector<8x4xbf16>
    %23 = vector.extract_strided_slice %17 {offsets = [4, 0], sizes = [4, 256], strides = [1, 1]} : vector<32x256xbf16> to vector<4x256xbf16>
    %cst_18 = arith.constant dense<0.000000e+00> : vector<8x256xf32>
    %24 = tpu.matmul %22, %23, %cst_18 {dimension_numbers = #tpu.dot_dimension_numbers<[1], [0], [0], [1], [0, 0, 1, 1], [], []>} : vector<8x4xbf16>, vector<4x256xbf16>, vector<8x256xf32> -> vector<8x256xf32>
    %c0_19 = arith.constant 0 : index
    %c256 = arith.constant 256 : index
    %25 = vector.load %arg9[%c0_19, %c256] : memref<8x2048xf32, #tpu.memory_space<vmem>>, vector<8x256xf32>
    tpu.vector_store %arg9[%c0_19, %c256], %24 {strides = array<i32>} : memref<8x2048xf32, #tpu.memory_space<vmem>>, vector<8x256xf32>,
    %26 = vector.extract_strided_slice %11 {offsets = [0, 8], sizes = [8, 4], strides = [1, 1]} : vector<8x32xbf16> to vector<8x4xbf16>
    %27 = vector.extract_strided_slice %17 {offsets = [8, 0], sizes = [4, 256], strides = [1, 1]} : vector<32x256xbf16> to vector<4x256xbf16>
    %cst_20 = arith.constant dense<0.000000e+00> : vector<8x256xf32>
    %28 = tpu.matmul %26, %27, %cst_20 {dimension_numbers = #tpu.dot_dimension_numbers<[1], [0], [0], [1], [0, 0, 1, 1], [], []>} : vector<8x4xbf16>, vector<4x256xbf16>, vector<8x256xf32> -> vector<8x256xf32>
    %c0_21 = arith.constant 0 : index
    %c512 = arith.constant 512 : index
    %29 = vector.load %arg9[%c0_21, %c512] : memref<8x2048xf32, #tpu.memory_space<vmem>>, vector<8x256xf32>
    tpu.vector_store %arg9[%c0_21, %c512], %28 {strides = array<i32>} : memref<8x2048xf32, #tpu.memory_space<vmem>>, vector<8x256xf32>,
    %30 = vector.extract_strided_slice %11 {offsets = [0, 12], sizes = [8, 4], strides = [1, 1]} : vector<8x32xbf16> to vector<8x4xbf16>
    %31 = vector.extract_strided_slice %17 {offsets = [12, 0], sizes = [4, 256], strides = [1, 1]} : vector<32x256xbf16> to vector<4x256xbf16>
    %cst_22 = arith.constant dense<0.000000e+00> : vector<8x256xf32>
    %32 = tpu.matmul %30, %31, %cst_22 {dimension_numbers = #tpu.dot_dimension_numbers<[1], [0], [0], [1], [0, 0, 1, 1], [], []>} : vector<8x4xbf16>, vector<4x256xbf16>, vector<8x256xf32> -> vector<8x256xf32>
    %c0_23 = arith.constant 0 : index
    %c768 = arith.constant 768 : index
    %33 = vector.load %arg9[%c0_23, %c768] : memref<8x2048xf32, #tpu.memory_space<vmem>>, vector<8x256xf32>
    tpu.vector_store %arg9[%c0_23, %c768], %32 {strides = array<i32>} : memref<8x2048xf32, #tpu.memory_space<vmem>>, vector<8x256xf32>,
    %34 = vector.extract_strided_slice %11 {offsets = [0, 16], sizes = [8, 4], strides = [1, 1]} : vector<8x32xbf16> to vector<8x4xbf16>
    %35 = vector.extract_strided_slice %17 {offsets = [16, 0], sizes = [4, 256], strides = [1, 1]} : vector<32x256xbf16> to vector<4x256xbf16>
    %cst_24 = arith.constant dense<0.000000e+00> : vector<8x256xf32>
    %36 = tpu.matmul %34, %35, %cst_24 {dimension_numbers = #tpu.dot_dimension_numbers<[1], [0], [0], [1], [0, 0, 1, 1], [], []>} : vector<8x4xbf16>, vector<4x256xbf16>, vector<8x256xf32> -> vector<8x256xf32>
    %c0_25 = arith.constant 0 : index
    %c1024 = arith.constant 1024 : index
    %37 = vector.load %arg9[%c0_25, %c1024] : memref<8x2048xf32, #tpu.memory_space<vmem>>, vector<8x256xf32>
    tpu.vector_store %arg9[%c0_25, %c1024], %36 {strides = array<i32>} : memref<8x2048xf32, #tpu.memory_space<vmem>>, vector<8x256xf32>,
    %38 = vector.extract_strided_slice %11 {offsets = [0, 20], sizes = [8, 4], strides = [1, 1]} : vector<8x32xbf16> to vector<8x4xbf16>
    %39 = vector.extract_strided_slice %17 {offsets = [20, 0], sizes = [4, 256], strides = [1, 1]} : vector<32x256xbf16> to vector<4x256xbf16>
    %cst_26 = arith.constant dense<0.000000e+00> : vector<8x256xf32>
    %40 = tpu.matmul %38, %39, %cst_26 {dimension_numbers = #tpu.dot_dimension_numbers<[1], [0], [0], [1], [0, 0, 1, 1], [], []>} : vector<8x4xbf16>, vector<4x256xbf16>, vector<8x256xf32> -> vector<8x256xf32>
    %c0_27 = arith.constant 0 : index
    %c1280 = arith.constant 1280 : index
    %41 = vector.load %arg9[%c0_27, %c1280] : memref<8x2048xf32, #tpu.memory_space<vmem>>, vector<8x256xf32>
    tpu.vector_store %arg9[%c0_27, %c1280], %40 {strides = array<i32>} : memref<8x2048xf32, #tpu.memory_space<vmem>>, vector<8x256xf32>,
    %42 = vector.extract_strided_slice %11 {offsets = [0, 24], sizes = [8, 4], strides = [1, 1]} : vector<8x32xbf16> to vector<8x4xbf16>
    %43 = vector.extract_strided_slice %17 {offsets = [24, 0], sizes = [4, 256], strides = [1, 1]} : vector<32x256xbf16> to vector<4x256xbf16>
    %cst_28 = arith.constant dense<0.000000e+00> : vector<8x256xf32>
    %44 = tpu.matmul %42, %43, %cst_28 {dimension_numbers = #tpu.dot_dimension_numbers<[1], [0], [0], [1], [0, 0, 1, 1], [], []>} : vector<8x4xbf16>, vector<4x256xbf16>, vector<8x256xf32> -> vector<8x256xf32>
    %c0_29 = arith.constant 0 : index
    %c1536 = arith.constant 1536 : index
    %45 = vector.load %arg9[%c0_29, %c1536] : memref<8x2048xf32, #tpu.memory_space<vmem>>, vector<8x256xf32>
    tpu.vector_store %arg9[%c0_29, %c1536], %44 {strides = array<i32>} : memref<8x2048xf32, #tpu.memory_space<vmem>>, vector<8x256xf32>,
    %46 = vector.extract_strided_slice %11 {offsets = [0, 28], sizes = [8, 4], strides = [1, 1]} : vector<8x32xbf16> to vector<8x4xbf16>
    %47 = vector.extract_strided_slice %17 {offsets = [28, 0], sizes = [4, 256], strides = [1, 1]} : vector<32x256xbf16> to vector<4x256xbf16>
    %cst_30 = arith.constant dense<0.000000e+00> : vector<8x256xf32>
    %48 = tpu.matmul %46, %47, %cst_30 {dimension_numbers = #tpu.dot_dimension_numbers<[1], [0], [0], [1], [0, 0, 1, 1], [], []>} : vector<8x4xbf16>, vector<4x256xbf16>, vector<8x256xf32> -> vector<8x256xf32>
    %c0_31 = arith.constant 0 : index
    %c1792 = arith.constant 1792 : index
    %49 = vector.load %arg9[%c0_31, %c1792] : memref<8x2048xf32, #tpu.memory_space<vmem>>, vector<8x256xf32>
    tpu.vector_store %arg9[%c0_31, %c1792], %48 {strides = array<i32>} : memref<8x2048xf32, #tpu.memory_space<vmem>>, vector<8x256xf32>,
    %c0_32 = arith.constant 0 : index
    %c0_33 = arith.constant 0 : index
    %50 = vector.load %arg9[%c0_32, %c0_33] : memref<8x2048xf32, #tpu.memory_space<vmem>>, vector<8x2048xf32>
    %cst_34 = arith.constant dense<0xFF800000> : vector<8xf32>
    %51 = vector.multi_reduction <maximumf>, %50, %cst_34 [1] : vector<8x2048xf32> to vector<8xf32>
    %52 = vector.shape_cast %51 : vector<8xf32> to vector<8x1xf32>
    %53 = vector.broadcast %52 : vector<8x1xf32> to vector<8x2048xf32>
    %54 = arith.subf %50, %53 : vector<8x2048xf32>
    %55 = math.exp %54 : vector<8x2048xf32>
    %cst_35 = arith.constant dense<0.000000e+00> : vector<8xf32>
    %56 = vector.multi_reduction <add>, %55, %cst_35 [1] : vector<8x2048xf32> to vector<8xf32>
    %57 = vector.shape_cast %56 : vector<8xf32> to vector<8x1xf32>
    %58 = tpu.reciprocal %57 {approx = true} : vector<8x1xf32> -> vector<8x1xf32>
    %59 = vector.broadcast %58 : vector<8x1xf32> to vector<8x2048xf32>
    %60 = arith.mulf %55, %59 : vector<8x2048xf32>
    %c0_36 = arith.constant 0 : index
    %c0_37 = arith.constant 0 : index
    %c0_38 = arith.constant 0 : index
    %61 = vector.load %arg8[%c0_36, %c0_37, %c0_38] : memref<1x8x2048xf32, #tpu.memory_space<vmem>>, vector<1x8x2048xf32>
    %62 = vector.shape_cast %61 : vector<1x8x2048xf32> to vector<8x2048xf32>
    %63 = vector.shape_cast %60 : vector<8x2048xf32> to vector<1x8x2048xf32>
    tpu.vector_store %arg8[%c0_36, %c0_37, %c0_38], %63 {strides = array<i32>} : memref<1x8x2048xf32, #tpu.memory_space<vmem>>, vector<1x8x2048xf32>,
    return
  }
  func.func @transform_0(%arg0: i32, %arg1: i32) -> (i32, i32, i32) {
    %c0_i32 = arith.constant 0 : i32
    %c0_i32_0 = arith.constant 0 : i32
    return %arg0, %arg1, %c0_i32 : i32, i32, i32
  }
  func.func @transform_1(%arg0: i32, %arg1: i32) -> (i32, i32, i32) {
    %c0_i32 = arith.constant 0 : i32
    %c0_i32_0 = arith.constant 0 : i32
    %c0_i32_1 = arith.constant 0 : i32
    return %arg0, %c0_i32, %c0_i32_0 : i32, i32, i32
  }
  func.func @transform_2(%arg0: i32, %arg1: i32) -> (i32, i32) {
    %c0_i32 = arith.constant 0 : i32
    %c0_i32_0 = arith.constant 0 : i32
    %c0_i32_1 = arith.constant 0 : i32
    return %c0_i32, %c0_i32_0 : i32, i32
  }
  func.func @transform_3(%arg0: i32, %arg1: i32) -> (i32, i32) {
    %c0_i32 = arith.constant 0 : i32
    %c0_i32_0 = arith.constant 0 : i32
    %c0_i32_1 = arith.constant 0 : i32
    return %c0_i32, %c0_i32_0 : i32, i32
  }
  func.func @transform_4(%arg0: i32, %arg1: i32) -> (i32, i32) {
    %c0_i32 = arith.constant 0 : i32
    %c0_i32_0 = arith.constant 0 : i32
    %c0_i32_1 = arith.constant 0 : i32
    return %c0_i32, %c0_i32_0 : i32, i32
  }
  func.func @transform_5(%arg0: i32, %arg1: i32) -> (i32, i32) {
    %c0_i32 = arith.constant 0 : i32
    %c0_i32_0 = arith.constant 0 : i32
    %c0_i32_1 = arith.constant 0 : i32
    return %c0_i32, %c0_i32_0 : i32, i32
  }
  func.func @transform_6(%arg0: i32, %arg1: i32) -> (i32, i32, i32) {
    %c0_i32 = arith.constant 0 : i32
    %c0_i32_0 = arith.constant 0 : i32
    return %arg0, %arg1, %c0_i32 : i32, i32, i32
  }
}

</mosaic_0001>

<bundles_post_ra>
// kernel: tpu_custom_call.1
= control target key start
LH: loop header
LB: loop body
LE: loop exit
PB: predicated region body
PF: predicated region fallthrough
CT: control target
= control target key end

     0   :  { %11 = vsyncpa [#allocation4], 0  ;;  %s1517_s0 = inlined_call_operand.vmem [shape: bf16[2,8,4], index: 0, kind: input, shape index: {}]   ;;  %s1518_s1 = inlined_call_operand.vmem [shape: bf16[2,4,256], index: 1, kind: input, shape index: {}]   ;;  %s1519_s2 = inlined_call_operand.vmem [shape: bf16[4,32], index: 2, kind: input, shape index: {}]   ;;  %s1520_s3 = inlined_call_operand.vmem [shape: f32[1,32], index: 3, kind: input, shape index: {}]   ;;  %s1521_s4 = inlined_call_operand.vmem [shape: bf16[32,4], index: 4, kind: input, shape index: {}]   ;;  %s1522_s5 = inlined_call_operand.vmem [shape: f32[32,1], index: 5, kind: input, shape index: {}]   ;;  %s1523_s6 = inlined_call_operand.hbm [shape: f32[2,8,2048], index: 6, kind: output, shape index: {}]  }
   0x1   :  { %13 = vsyncpa [#allocation4 + $0x1], 0  ;;  %s1264_s21 = smov 0   ;;  %s1266_s22 = smov 0  }
   0x2   :  { %s1268_s23 = smov 0   ;;  %s1270_s24 = smov 0  }
   0x3   :  { %s1272_s25 = smov 0   ;;  %s1274_s26 = smov 0  }
   0x4 LB: > { %s993_s27 = sadd.s32 4294967295, %s1219_s26   ;;  %s994_s28 = sadd.s32 4294967294, %s1219_s26   ;;  %s1219_s26 = sphi %s1274_s26, %s19_s26   ;;  %s1215_s25 = sphi %s1272_s25, %s1530_s25   ;;  %s1211_s24 = sphi %s1270_s24, %s1529_s24   ;;  %s1207_s23 = sphi %s1268_s23, %s1528_s23   ;;  %s1203_s22 = sphi %s1266_s22, %s1527_s22   ;;  %s1199_s21 = sphi %s1264_s21, %s1526_s21  }
   0x5   : > { %s31_s29 = sadd.s32 1, %s1215_s25  ;;  %s178_s30 = sadd.s32 1, %s1207_s23 }
   0x6   : > { %p33_p0 = scmp.ge.s32.totalorder %s31_s29, 2  ;;  %p188_p1 = scmp.ne.s32.totalorder %s1207_s23, %s1203_s22 }
   0x7   : > { %p189_p2 = scmp.eq.s32.totalorder %s993_s27, 1  ;;  %p194_p3 = scmp.ne.s32.totalorder %s1203_s22, %s1199_s21 }
   0x8   : > { %s1532_s29 = smov (%p33_p0, %s31_s29), 0  ;;  %p195_p5 = scmp.eq.s32.totalorder %s994_s28, 1 }
   0x9   : > { %p1304_p4 = por %p189_p2, %p188_p1  ;;  %s173_s8 = ssub.s32 %s1215_s25, %s1532_s29 }
   0xa   : > { %p997_p6 = scmp.ge.s32.totalorder %s1219_s26, 1  ;;  %p176_p7 = scmp.eq.s32.totalorder %s173_s8, 0 }
   0xb   : > { %p1311_p8 = por %p195_p5, %p194_p3  ;;  %p243_p9 = scmp.lt.s32.totalorder %s1219_s26, 3 }
   0xc   : > { %s1317_s10 = scalar_select %p176_p7, %s1207_s23, %s178_s30  }
   0xd   : > { %p244_p10 = pnand %p997_p6, %p243_p9 }
   0xe   : > { %p280_p11 = scmp.lt.s32.totalorder (!%p244_p10), %s1211_s24, 1  ;;  %s1224_s19 = smov (!%p244_p10), 124  }
   0xf   : > { %247 = sbr.rel (%p244_p10) target bundleno = 764 (0x2fc), region = 44  ;;  %s1225_s28 = smov (!%p244_p10), 108  }
  0x10   : > { %s1226_s30 = smov (!%p244_p10), 112   ;;  %s1227_s12 = smov (!%p244_p10), 100  }
  0x11   : > { %s1228_s13 = smov (!%p244_p10), 104   ;;  %s277_s14 = sand.u32 (!%p244_p10), 1, %s1203_s22  }
  0x12   : > { %s998_s15 = sshll.u32 (!%p244_p10), %s277_s14, 7 }
  0x13   : > { %s1460_s16 = scalar_lea.vmem (!%p244_p10), [#allocation3], %s998_s15 }
  0x14   : > { %v295_v0 = vld [vmem:[%s1519_s2] sm:$0x3]  ;;  %vm304_vm0 = vcmask 1041408   ;;  %v328_v3 = vld [vmem:[%s1522_s5 + $0x8] sm:$0xff]  ;;  %s281_s17 = scalar_select %p280_p11, %s1211_s24, 1  ;;  %v1221_v4 = vmov 0  }
  0x15   : > { %v306_v1 = vsel %vm304_vm0, %v295_v0, 0  ;;  %v327_v2 = vld [vmem:[%s1522_s5] sm:$0xff]  ;;  %1103 = vset.pattern.permute.xlu0 %v1221_v4  ;;  %1104 = vset.pattern.permute.xlu1 %v1221_v4  ;;  %vm300_vm1 = vcmask 31744   ;;  %v1038_v12 = vld [vmem:[%s1521_s4 + $0x8] sm:$0xff]  ;;  %v329_v23 = vld [vmem:[%s1522_s5 + $0x10] sm:$0xff] }
  0x16   : > { %315 = vmatpush.bf16.msra.mxu0 %v306_v1  ;;  %333 = vperm.xlu0 %1103, %v327_v2   ;;  %s999_s18 = sshll.u32 %s281_s17, 2  ;;  %v1037_v10 = vld [vmem:[%s1521_s4] sm:$0xff]  ;;  %s1222_s17 = smov 116   ;;  %v330_v32 = vld [vmem:[%s1522_s5 + $0x18] sm:$0xff] }
  0x17   : > { %338 = vperm.xlu1 %1104, %v328_v3   ;;  %1105 = vset.pattern.permute.xlu2 %v1221_v4  ;;  %s286_s27 = scalar_lea.vmem %s1517_s0, %s999_s18  ;;  %s291_s8 = scalar_lea.vmem %s1518_s1, %s999_s18  ;;  %v1106_v13 = vld [vmem:[%s1520_s3] ss:$0 sm:$0xff] }
  0x18   : > { %v293_v5 = vld [vmem:[%s286_s27] sm:$0xf]  ;;  %s1223_s18 = smov 120  }
  0x19   : > { %v294_v6 = vld [vmem:[%s291_s8] sm:$0xf]  ;;  %1002 = vmatmul.msk.bf16.vlgmr.msra.gmra.mxu0 %vm300_vm1, %v293_v5 }
  0x1a   : > { %362 = vst [vmem:[#allocation1] ss:$4 sm:$0xff] %v294_v6 }
  0x21   : > { %v364_v7 = vld.sshfl [vmem:[#allocation1 + $0x8] sm:$0xff pattern:$0x73625140]  ;;  %v363_v8 = vld.sshfl [vmem:[#allocation1] sm:$0xff pattern:$0x73625140] }
  0x22   : > { %v373_v9 = vsel %vm304_vm0, %v364_v7, 0  ;;  %v371_v11 = vsel %vm304_vm0, %v363_v8, 0 }
  0x23   : > { %401 = vmatpush.bf16.msra.mxu2 %v373_v9  ;;  %382 = vmatpush.bf16.msra.mxu1 %v371_v11 }
  0x26   : > { %1013 = vmatmul.msk.bf16.vlgmr.msra.gmra.mxu2 %vm300_vm1, %v1037_v10  ;;  %1011 = vmatmul.msk.bf16.vlgmr.msra.gmra.mxu1 %vm300_vm1, %v1037_v10 }
  0x36   : > { %1014 = vmatmul.msk.bf16.gmra.mxu2 %vm300_vm1, %v1038_v12  ;;  %1012 = vmatmul.msk.bf16.gmra.mxu1 %vm300_vm1, %v1038_v12 }
  0x88   : > { %v334_v21 = vpop.permute.xlu0 %333 }
  0x89   : > { %v339_v28 = vpop.permute.xlu1 %338 }
  0x96   : > { %v317_v14 = vpop.f32.mrf.mxu0 }
  0x97   : > { %v318_v15 = vadd.f32 %v1106_v13, %v317_v14 }
  0x99   : > { %v321_v16 = vmul.f32 0.5, %v318_v15 }
  0x9b   : > { %v322_v17 = vpack.c.bf16 %v321_v16, %v321_v16 }
  0x9d   : > { %v460_v18 = vunpack.c.l.b16 %v322_v17 }
  0x9e   : > { %v319_v19 = vpop.f32.mrf.mxu0 }
  0x9f   : > { %v461_v20 = vpack.c.b16 %v460_v18, %v460_v18 }
  0xa1   : > { %547 = vrot.lane.b32.xlu2 %v461_v20, %s1222_s17  ;;  %503 = vrot.lane.b32.xlu1 %v461_v20, %s1223_s18  ;;  %s1039_s17 = sshll.u32 %s1211_s24, 7  ;;  %s905_s24 = sshll.u32 %s1460_s16, 4  ;;  %s906_s24 = int_to_ptr.vmem [resolvable:$true] %s905_s24 }
  0xa2   : > { %462 = vrot.lane.b32.xlu0 %v461_v20, %s1224_s19  ;;  %s903_s20 = scalar_lea.hbm %s1523_s6, %s1039_s17 }
  0xa3   : > { %v384_v22 = vpop.f32.mrf.mxu1  ;;  %s907_s27 = sshll.u32 %s903_s20, 4  ;;  %s908_s27 = int_to_ptr.hbm [resolvable:$true] %s907_s27 }
  0xa4   : > { %v385_v24 = vadd.f32 %v384_v22, %v334_v21 }
  0xa9   : > { %v403_v25 = vpop.f32.mrf.mxu2  ;;  %632 = vrot.lane.b32.xlu1 %v461_v20, %s1225_s28  ;;  %343 = vperm.xlu2 %1105, %v329_v23   ;;  %s890_s28 = scalar_lea.sflag [#allocation4], %s277_s14 }
  0xaa   : > { %v404_v26 = vadd.f32 %v403_v25, %v334_v21  ;;  %588 = vrot.lane.b32.xlu0 %v461_v20, %s1226_s30  ;;  %s1155_s30 = sshra.s32 %s908_s27, 4  ;;  %s1156_s30 = int_to_ptr.hbm [resolvable:$true] %s1155_s30 }
  0xab   : > { %v386_v29 = vpop.f32.mrf.mxu1  ;;  %s1157_s8 = scalar_lea.hbm %s1156_s30, 128  ;;  %p1162_p1 = scmp.lt.s32.totalorder %s1156_s30, %s1523_s6 }
  0xac   : > { %v413_v27 = vpack.c.bf16 %v404_v26, %v385_v24  ;;  %v387_v35 = vadd.f32 %v386_v29, %v339_v28  ;;  %p1158_p12 = scmp.ne.s32.totalorder %s1156_s30, %s1157_s8 }
  0xae   : > { %v418_v30 = vunpack.c.l.b16 %v413_v27  ;;  %v419_v31 = vunpack.c.h.b16 %v413_v27  ;;  %p1159_p13 = pnand %p1158_p12, %p1304_p4 }
  0xb0   : > { %v420_v33 = vpack.c.b16 %v418_v30, %v418_v30  ;;  %v421_v34 = vpack.c.b16 %v419_v31, %v419_v31  ;;  %p1160_p0 = pneg %p1159_p13 }
  0xb1   : > { %v405_v36 = vpop.f32.mrf.mxu2  ;;  %717 = vrot.lane.b32.xlu1 %v461_v20, %s1227_s12  ;;  %348 = vperm.xlu2 %1105, %v330_v32  }
  0xb2   : > { %v426_v37 = vsel %vm304_vm0, %v420_v33, 0  ;;  %v429_v38 = vsel %vm304_vm0, %v421_v34, 0  ;;  %v465_v39 = vrot.slane %v421_v34, 2  ;;  %v406_v40 = vadd.f32 %v405_v36, %v339_v28  ;;  %673 = vrot.lane.b32.xlu0 %v461_v20, %s1228_s13  ;;  %s1161_s13 = scalar_lea.hbm %s1523_s6, 256 }
  0xb3   : > { %438 = vmatpush.bf16.msra.mxu3 %v426_v37  ;;  %v464_v41 = vrot.slane %v420_v33, 2  ;;  %451 = vmatpush.bf16.msrb.mxu0 %v429_v38  ;;  %v389_v56 = vpop.f32.mrf.mxu1  ;;  %p1163_p2 = scmp.lt.s32.totalorder %s1161_s13, %s1157_s8 }
  0xb4   : > { %v414_v42 = vpack.c.bf16 %v406_v40, %v387_v35  ;;  %v473_v43 = vsel %vm304_vm0, %v465_v39, 0 }
  0xb5   : > { %v470_v44 = vsel %vm304_vm0, %v464_v41, 0  ;;  %p1164_p3 = por %p1163_p2, %p1162_p1 }
  0xb6   : > { %1015 = vmatmul.msk.bf16.vlgmr.msra.gmra.mxu3 %vm300_vm1, %v322_v17  ;;  %v506_v45 = vunpack.c.l.b16 %v414_v42  ;;  %v507_v46 = vunpack.c.h.b16 %v414_v42  ;;  %1016 = vmatmul.msk.bf16.vlgmr.msrb.gmra.mxu0 %vm300_vm1, %v322_v17 }
  0xb7   : > { %495 = vmatpush.bf16.msra.mxu0 %v473_v43  ;;  %482 = vmatpush.bf16.msrb.mxu3 %v470_v44  ;;  %p1165_p5 = pnand %p1164_p3, %p1160_p0 }
  0xb8   : > { %v508_v47 = vpack.c.b16 %v506_v45, %v506_v45  ;;  %v509_v48 = vpack.c.b16 %v507_v46, %v507_v46 }
  0xb9   : > { %v408_v57 = vpop.f32.mrf.mxu2 }
  0xba   : > { %v514_v49 = vsel %vm304_vm0, %v508_v47, 0  ;;  %v517_v50 = vsel %vm304_vm0, %v509_v48, 0  ;;  %v549_v51 = vrot.slane %v508_v47, 2  ;;  %v550_v52 = vrot.slane %v509_v48, 2 }
  0xbb   : > { %526 = vmatpush.bf16.msrb.mxu1 %v514_v49  ;;  %539 = vmatpush.bf16.msrb.mxu2 %v517_v50  ;;  %v391_v0 = vpop.f32.mrf.mxu1 }
  0xbc   : > { %v555_v53 = vsel %vm304_vm0, %v549_v51, 0  ;;  %v558_v54 = vsel %vm304_vm0, %v550_v52, 0 }
  0xbd   : > { %567 = vmatpush.bf16.msra.mxu3 %v555_v53  ;;  %580 = vmatpush.bf16.msrb.mxu0 %v558_v54 }
  0xc1   : > { %v410_v1 = vpop.f32.mrf.mxu2 }
  0xfb   : > { %v548_v55 = vpop.permute.xlu2 %547 }
 0x103   : > { %v344_v58 = vpop.permute.xlu2 %343 }
 0x104   : > { %v390_v59 = vadd.f32 %v389_v56, %v344_v58  ;;  %v409_v60 = vadd.f32 %v408_v57, %v344_v58 }
 0x106   : > { %v415_v61 = vpack.c.bf16 %v409_v60, %v390_v59 }
 0x108   : > { %v591_v62 = vunpack.c.l.b16 %v415_v61  ;;  %v592_v63 = vunpack.c.h.b16 %v415_v61 }
 0x10a   : > { %v593_v2 = vpack.c.b16 %v591_v62, %v591_v62  ;;  %v594_v3 = vpack.c.b16 %v592_v63, %v592_v63 }
 0x10b   : > { %v349_v4 = vpop.permute.xlu2 %348 }
 0x10c   : > { %v392_v5 = vadd.f32 %v391_v0, %v349_v4  ;;  %v411_v6 = vadd.f32 %v410_v1, %v349_v4  ;;  %v599_v7 = vsel %vm304_vm0, %v593_v2, 0  ;;  %v602_v8 = vsel %vm304_vm0, %v594_v3, 0 }
 0x10d   : > { %611 = vmatpush.bf16.msra.mxu1 %v599_v7  ;;  %624 = vmatpush.bf16.msra.mxu2 %v602_v8  ;;  %v634_v12 = vrot.slane %v593_v2, 2  ;;  %v635_v13 = vrot.slane %v594_v3, 2 }
 0x10e   : > { %v416_v9 = vpack.c.bf16 %v411_v6, %v392_v5 }
 0x10f   : > { %v640_v20 = vsel %vm304_vm0, %v634_v12, 0  ;;  %v643_v21 = vsel %vm304_vm0, %v635_v13, 0 }
 0x110   : > { %v676_v10 = vunpack.c.l.b16 %v416_v9  ;;  %v677_v11 = vunpack.c.h.b16 %v416_v9 }
 0x112   : > { %v678_v14 = vpack.c.b16 %v676_v10, %v676_v10  ;;  %v679_v15 = vpack.c.b16 %v677_v11, %v677_v11 }
 0x113   : > { %v504_v16 = vpop.permute.xlu1 %503 }
 0x114   : > { %v463_v17 = vpop.permute.xlu0 %462  ;;  %1019 = vmatmul.msk.bf16.vlgmr.msrb.gmra.mxu1 %vm300_vm1, %v504_v16  ;;  %1020 = vmatmul.msk.bf16.vlgmr.msrb.gmra.mxu2 %vm300_vm1, %v504_v16  ;;  %v684_v18 = vsel %vm304_vm0, %v678_v14, 0  ;;  %v687_v19 = vsel %vm304_vm0, %v679_v15, 0  ;;  %v719_v22 = vrot.slane %v678_v14, 2  ;;  %v720_v23 = vrot.slane %v679_v15, 2 }
 0x115   : > { %1017 = vmatmul.msk.bf16.vlgmr.msrb.gmra.mxu3 %vm300_vm1, %v463_v17  ;;  %1018 = vmatmul.msk.bf16.vlgmr.msra.gmra.mxu0 %vm300_vm1, %v463_v17 }
 0x116   : > { %696 = vmatpush.bf16.msrb.mxu1 %v684_v18  ;;  %709 = vmatpush.bf16.msrb.mxu2 %v687_v19  ;;  %v725_v25 = vsel %vm304_vm0, %v719_v22, 0  ;;  %v728_v26 = vsel %vm304_vm0, %v720_v23, 0 }
 0x117   : > { %652 = vmatpush.bf16.msrb.mxu3 %v640_v20  ;;  %665 = vmatpush.bf16.msra.mxu0 %v643_v21 }
 0x11b   : > { %v633_v29 = vpop.permute.xlu1 %632 }
 0x11c   : > { %v589_v24 = vpop.permute.xlu0 %588 }
 0x123   : > { %v718_v33 = vpop.permute.xlu1 %717 }
 0x124   : > { %1023 = vmatmul.msk.bf16.vlgmr.msra.gmra.mxu1 %vm300_vm1, %v589_v24  ;;  %1024 = vmatmul.msk.bf16.vlgmr.msra.gmra.mxu2 %vm300_vm1, %v589_v24  ;;  %v674_v27 = vpop.permute.xlu0 %673 }
 0x125   : > { %1021 = vmatmul.msk.bf16.vlgmr.msra.gmra.mxu3 %vm300_vm1, %v548_v55  ;;  %1022 = vmatmul.msk.bf16.vlgmr.msrb.gmra.mxu0 %vm300_vm1, %v548_v55 }
 0x126   : > { %737 = vmatpush.bf16.msra.mxu3 %v725_v25  ;;  %750 = vmatpush.bf16.msrb.mxu0 %v728_v26 }
 0x133   : > { %v453_v28 = vpop.f32.mrf.mxu0 }
 0x134   : > { %1027 = vmatmul.msk.bf16.vlgmr.msrb.gmra.mxu1 %vm300_vm1, %v674_v27  ;;  %1028 = vmatmul.msk.bf16.vlgmr.msrb.gmra.mxu2 %vm300_vm1, %v674_v27 }
 0x135   : > { %1025 = vmatmul.msk.bf16.vlgmr.msrb.gmra.mxu3 %vm300_vm1, %v633_v29  ;;  %1026 = vmatmul.msk.bf16.vlgmr.msra.gmra.mxu0 %vm300_vm1, %v633_v29 }
 0x139   : > { %v440_v30 = vpop.f32.mrf.mxu3 }
 0x13b   : > { %v455_v31 = vpop.f32.mrf.mxu0 }
 0x141   : > { %v442_v32 = vpop.f32.mrf.mxu3 }
 0x145   : > { %1029 = vmatmul.msk.bf16.vlgmr.msra.gmra.mxu3 %vm300_vm1, %v718_v33  ;;  %1030 = vmatmul.msk.bf16.vlgmr.msrb.gmra.mxu0 %vm300_vm1, %v718_v33 }
 0x191   : > { %v528_v34 = vpop.f32.mrf.mxu1 }
 0x192   : > { %v497_v35 = vpop.f32.mrf.mxu0  ;;  %v774_v60 = vmax.f32 %v440_v30, %v528_v34 }
 0x197   : > { %v541_v36 = vpop.f32.mrf.mxu2 }
 0x198   : > { %v484_v37 = vpop.f32.mrf.mxu3  ;;  %v775_v59 = vmax.f32 %v453_v28, %v541_v36 }
 0x199   : > { %v530_v38 = vpop.f32.mrf.mxu1 }
 0x19a   : > { %v499_v39 = vpop.f32.mrf.mxu0 }
 0x19f   : > { %v543_v40 = vpop.f32.mrf.mxu2 }
 0x1a0   : > { %v486_v41 = vpop.f32.mrf.mxu3 }
 0x1a1   : > { %v1391_v42 = vpop.f32.mrf.mxu1 }
 0x1a2   : > { %v1393_v43 = vpop.f32.mrf.mxu0  ;;  %v778_v0 = vmax.f32 %v774_v60, %v1391_v42 }
 0x1a3   : > { %v777_v61 = vmax.f32 %v497_v35, %v1393_v43 }
 0x1a7   : > { %v1395_v44 = vpop.f32.mrf.mxu2 }
 0x1a8   : > { %v569_v45 = vpop.f32.mrf.mxu3  ;;  %v779_v63 = vmax.f32 %v775_v59, %v1395_v44 }
 0x1a9   : > { %v615_v46 = vpop.f32.mrf.mxu1  ;;  %v776_v62 = vmax.f32 %v484_v37, %v569_v45 }
 0x1aa   : > { %v584_v47 = vpop.f32.mrf.mxu0 }
 0x1af   : > { %v628_v48 = vpop.f32.mrf.mxu2 }
 0x1b0   : > { %v571_v49 = vpop.f32.mrf.mxu3 }
 0x1b1   : > { %v1397_v50 = vpop.f32.mrf.mxu1 }
 0x1b2   : > { %v1399_v51 = vpop.f32.mrf.mxu0  ;;  %v782_v5 = vmax.f32 %v778_v0, %v1397_v50 }
 0x1b3   : > { %v781_v1 = vmax.f32 %v777_v61, %v1399_v51 }
 0x1b7   : > { %v1401_v52 = vpop.f32.mrf.mxu2 }
 0x1b8   : > { %v1403_v53 = vpop.f32.mrf.mxu3  ;;  %v783_v3 = vmax.f32 %v779_v63, %v1401_v52 }
 0x1b9   : > { %v700_v54 = vpop.f32.mrf.mxu1  ;;  %v780_v2 = vmax.f32 %v776_v62, %v1403_v53 }
 0x1ba   : > { %v669_v55 = vpop.f32.mrf.mxu0  ;;  %v786_v9 = vmax.f32 %v782_v5, %v783_v3 }
 0x1bf   : > { %v713_v56 = vpop.f32.mrf.mxu2 }
 0x1c0   : > { %v656_v57 = vpop.f32.mrf.mxu3 }
 0x1c2   : > { %v1405_v58 = vpop.f32.mrf.mxu0 }
 0x1c3   : > { %v785_v6 = vmax.f32 %v781_v1, %v1405_v58 }
 0x1c8   : > { %v1413_v4 = vpop.f32.mrf.mxu3 }
 0x1c9   : > { %v784_v7 = vmax.f32 %v780_v2, %v1413_v4 }
 0x1ca   : > { %v754_v8 = vpop.f32.mrf.mxu0 }
 0x1cb   : > { %v787_v10 = vmax.f32 %v784_v7, %v785_v6 }
 0x1cd   : > { %v788_v11 = vmax.f32 %v786_v9, %v787_v10 }
 0x1cf   : > { %789 = vmax.xlane.f32.xlu2 %v788_v11 }
 0x1d0   : > { %v741_v12 = vpop.f32.mrf.mxu3 }
 0x242   : > { %v1418_v13 = vpop.xlane.xlu2 %789 }
 0x243   : > { %v791_v14 = vsub.f32 %v440_v30, %v1418_v13  ;;  %v792_v15 = vsub.f32 %v453_v28, %v1418_v13  ;;  %v793_v16 = vsub.f32 %v484_v37, %v1418_v13  ;;  %v794_v17 = vsub.f32 %v497_v35, %v1418_v13 }
 0x244   : > { %v795_v20 = vsub.f32 %v528_v34, %v1418_v13  ;;  %v796_v22 = vsub.f32 %v541_v36, %v1418_v13  ;;  %v797_v24 = vsub.f32 %v569_v45, %v1418_v13  ;;  %v798_v26 = vsub.f32 %v1393_v43, %v1418_v13 }
 0x245   : > { %v807_v18 = vmul.f32 1.442695, %v791_v14  ;;  %v809_v19 = vmul.f32 1.442695, %v792_v15  ;;  %v811_v21 = vmul.f32 1.442695, %v793_v16  ;;  %v799_v30 = vsub.f32 %v1391_v42, %v1418_v13 }
 0x246   : > { %v813_v23 = vmul.f32 1.442695, %v794_v17  ;;  %v815_v25 = vmul.f32 1.442695, %v795_v20  ;;  %v817_v27 = vmul.f32 1.442695, %v796_v22  ;;  %v800_v34 = vsub.f32 %v1395_v44, %v1418_v13 }
 0x247   : > { %1107 = vpow2.f32 %v807_v18  ;;  %v819_v31 = vmul.f32 1.442695, %v797_v24  ;;  %v821_v35 = vmul.f32 1.442695, %v798_v26  ;;  %v801_v38 = vsub.f32 %v1403_v53, %v1418_v13 }
 0x248   : > { %1109 = vpow2.f32 %v809_v19  ;;  %v823_v39 = vmul.f32 1.442695, %v799_v30  ;;  %v802_v42 = vsub.f32 %v1399_v51, %v1418_v13  ;;  %v825_v43 = vmul.f32 1.442695, %v800_v34 }
 0x249   : > { %1111 = vpow2.f32 %v811_v21  ;;  %v803_v44 = vsub.f32 %v1397_v50, %v1418_v13  ;;  %v827_v47 = vmul.f32 1.442695, %v801_v38  ;;  %v804_v53 = vsub.f32 %v1401_v52, %v1418_v13 }
 0x24a   : > { %1113 = vpow2.f32 %v813_v23  ;;  %v829_v54 = vmul.f32 1.442695, %v802_v42  ;;  %v805_v51 = vsub.f32 %v1413_v4, %v1418_v13  ;;  %v806_v50 = vsub.f32 %v1405_v58, %v1418_v13 }
 0x24b   : > { %1115 = vpow2.f32 %v815_v25  ;;  %v831_v57 = vmul.f32 1.442695, %v803_v44  ;;  %v833_v61 = vmul.f32 1.442695, %v804_v53 }
 0x24c   : > { %1117 = vpow2.f32 %v817_v27  ;;  %v835_v52 = vmul.f32 1.442695, %v805_v51  ;;  %v837_v2 = vmul.f32 1.442695, %v806_v50 }
 0x24d   : > { %v1429_v28 = vpop.eup %1107  ;;  %1119 = vpow2.f32 %v819_v31 }
 0x24e   : > { %v1431_v29 = vpop.eup %1109  ;;  %1121 = vpow2.f32 %v821_v35 }
 0x24f   : > { %v839_v32 = vadd.f32 %v1431_v29, %v1429_v28  ;;  %v1437_v33 = vpop.eup %1111  ;;  %1123 = vpow2.f32 %v823_v39 }
 0x250   : > { %v1114_v37 = vpop.eup %1113  ;;  %1125 = vpow2.f32 %v825_v43 }
 0x251   : > { %v840_v36 = vadd.f32 %v1437_v33, %v839_v32  ;;  %v1116_v41 = vpop.eup %1115  ;;  %1127 = vpow2.f32 %v827_v47 }
 0x252   : > { %v1118_v46 = vpop.eup %1117  ;;  %1129 = vpow2.f32 %v829_v54 }
 0x253   : > { %v841_v40 = vadd.f32 %v1114_v37, %v840_v36  ;;  %v1120_v49 = vpop.eup %1119  ;;  %1131 = vpow2.f32 %v831_v57 }
 0x254   : > { %v1122_v56 = vpop.eup %1121  ;;  %1133 = vpow2.f32 %v833_v61 }
 0x255   : > { %v842_v45 = vadd.f32 %v1116_v41, %v841_v40  ;;  %v1124_v60 = vpop.eup %1123  ;;  %1135 = vpow2.f32 %v835_v52 }
 0x256   : > { %v1126_v63 = vpop.eup %1125  ;;  %1137 = vpow2.f32 %v837_v2 }
 0x257   : > { %v843_v48 = vadd.f32 %v1118_v46, %v842_v45  ;;  %v1128_v1 = vpop.eup %1127 }
 0x258   : > { %v1130_v4 = vpop.eup %1129 }
 0x259   : > { %v844_v55 = vadd.f32 %v1120_v49, %v843_v48  ;;  %v1132_v6 = vpop.eup %1131 }
 0x25a   : > { %v1134_v58 = vpop.eup %1133 }
 0x25b   : > { %v845_v59 = vadd.f32 %v1122_v56, %v844_v55  ;;  %v1136_v9 = vpop.eup %1135 }
 0x25c   : > { %v1138_v11 = vpop.eup %1137 }
 0x25d   : > { %v846_v62 = vadd.f32 %v1124_v60, %v845_v59 }
 0x25f   : > { %v847_v0 = vadd.f32 %v1126_v63, %v846_v62 }
 0x261   : > { %v848_v3 = vadd.f32 %v1128_v1, %v847_v0 }
 0x263   : > { %v849_v5 = vadd.f32 %v1130_v4, %v848_v3 }
 0x265   : > { %v850_v7 = vadd.f32 %v1132_v6, %v849_v5 }
 0x267   : > { %v851_v8 = vadd.f32 %v1134_v58, %v850_v7 }
 0x269   : > { %v852_v10 = vadd.f32 %v1136_v9, %v851_v8 }
 0x26b   : > { %v853_v12 = vadd.f32 %v1138_v11, %v852_v10 }
 0x26d   : > { %854 = vadd.xlane.f32.xlu0 %v853_v12 }
 0x2e0   : > { %v855_v13 = vpop.xlane.xlu0 %854 }
 0x2e1   : > { %1139 = vrcp.f32 %v855_v13 }
 0x2e7   : > { %v1140_v14 = vpop.eup %1139 }
 0x2e8   : > { %v857_v15 = vmul.f32 %v1140_v14, %v1429_v28  ;;  %v858_v16 = vmul.f32 %v1140_v14, %v1431_v29  ;;  %v859_v17 = vmul.f32 %v1140_v14, %v1437_v33  ;;  %v860_v18 = vmul.f32 %v1140_v14, %v1114_v37 }
 0x2e9   : > { %v861_v19 = vmul.f32 %v1140_v14, %v1116_v41  ;;  %v862_v20 = vmul.f32 %v1140_v14, %v1118_v46  ;;  %v863_v21 = vmul.f32 %v1140_v14, %v1120_v49  ;;  %v864_v22 = vmul.f32 %v1140_v14, %v1122_v56 }
 0x2ea   : > { %873 = vst [vmem:[%s1460_s16] sm:$0xff] %v857_v15  ;;  %v865_v23 = vmul.f32 %v1140_v14, %v1124_v60  ;;  %v866_v24 = vmul.f32 %v1140_v14, %v1126_v63  ;;  %v867_v25 = vmul.f32 %v1140_v14, %v1128_v1  ;;  %v868_v26 = vmul.f32 %v1140_v14, %v1130_v4 }
 0x2eb   : > { %874 = vst [vmem:[%s1460_s16 + $0x8] sm:$0xff] %v858_v16  ;;  %v869_v27 = vmul.f32 %v1140_v14, %v1132_v6  ;;  %v870_v28 = vmul.f32 %v1140_v14, %v1134_v58  ;;  %v871_v29 = vmul.f32 %v1140_v14, %v1136_v9  ;;  %v872_v30 = vmul.f32 %v1140_v14, %v1138_v11 }
 0x2ec   : > { %875 = vst [vmem:[%s1460_s16 + $0x10] sm:$0xff] %v859_v17 }
 0x2ed   : > { %876 = vst [vmem:[%s1460_s16 + $0x18] sm:$0xff] %v860_v18 }
 0x2ee   : > { %877 = vst [vmem:[%s1460_s16 + $0x20] sm:$0xff] %v861_v19 }
 0x2ef   : > { %878 = vst [vmem:[%s1460_s16 + $0x28] sm:$0xff] %v862_v20 }
 0x2f0   : > { %879 = vst [vmem:[%s1460_s16 + $0x30] sm:$0xff] %v863_v21 }
 0x2f1   : > { %880 = vst [vmem:[%s1460_s16 + $0x38] sm:$0xff] %v864_v22 }
 0x2f2   : > { %881 = vst [vmem:[%s1460_s16 + $0x40] sm:$0xff] %v865_v23 }
 0x2f3   : > { %882 = vst [vmem:[%s1460_s16 + $0x48] sm:$0xff] %v866_v24 }
 0x2f4   : > { %883 = vst [vmem:[%s1460_s16 + $0x50] sm:$0xff] %v867_v25 }
 0x2f5   : > { %884 = vst [vmem:[%s1460_s16 + $0x58] sm:$0xff] %v868_v26 }
 0x2f6   : > { %885 = vst [vmem:[%s1460_s16 + $0x60] sm:$0xff] %v869_v27 }
 0x2f7   : > { %886 = vst [vmem:[%s1460_s16 + $0x68] sm:$0xff] %v870_v28 }
 0x2f8   : > { %887 = vst [vmem:[%s1460_s16 + $0x70] sm:$0xff] %v871_v29 }
 0x2f9   : > { %888 = vst [vmem:[%s1460_s16 + $0x78] sm:$0xff] %v872_v30 }
 0x2fa   : > { %1168 = shalt.err (!%p1165_p5)
}
 0x2fb   : > { %1040 = dma.vmem_to_hbm [thread:$0]  (%p1304_p4), %s906_s24, 2048, %s908_s27, %s890_s28  }
 0x2fc PF: > { %p1046_p6 = scmp.ge.s32.totalorder %s1219_s26, 2  ;;  %s919_s14 = sand.u32 1, %s1199_s21  }
 0x2fd   : > { %s920_s16 = scalar_lea.sflag [#allocation4], %s919_s14 }
 0x2fe   : > { %p1043_p7 = pnand %p1046_p6, %p1311_p8 }
 0x300   : > { %p1044_p9 = pneg %p1043_p7 }
 0x302   : > { %1194 = dma.done.wait (%p1044_p9), %s920_s16, 2048  }
 0x303   : > { %1196 = vsyncadd (%p1044_p9), %s920_s16, 4294965248  ;;  %s19_s26 = sadd.s32 1, %s1219_s26   ;;  %s1526_s21 = smov %s1203_s22 }
 0x304   : > { %p16_p10 = scmp.ge.s32.totalorder %s19_s26, 4   ;;  %s1527_s22 = smov %s1207_s23 }
 0x305   : > { %s1528_s23 = smov %s1317_s10  ;;  %s1529_s24 = smov %s1215_s25 }
 0x306   : > { %s1530_s25 = smov %s1532_s29  ;;  %18 = sbr.rel (!%p16_p10) target bundleno = 4 (0x4), region = 82 }
 0x30b   :  { %926 = vsyncpa [#allocation4], 1 }
 0x30c   :  { %928 = vsyncpa [#allocation4 + $0x1], 1 }

</bundles_post_ra>
